<compile_context>
chip_gen: v7x
topology: tpu7x:2x2x1
jax: 0.10.0
libtpu: 0.0.40
codegen_flags: <defaults>
</compile_context>

<pallas_src>
import numpy as np
import jax
import jax.numpy as jnp
from jax.experimental import pallas as pl
from jax.experimental.pallas import tpu as pltpu

# ---- module hyper-parameters (small, consistent with the module) ----
B = 2
IN_CHANNELS = 16      # in_channels
EMBEDD_DIM = 8        # embedd_dim
CONV_CHANNELS = 32    # conv_channels
KERNEL_SIZE = 3
DILATION = 1
T = 16                # sequence length
EPS = 1e-5            # GlobalLayerNorm eps
PAD = DILATION * (KERNEL_SIZE - 1) // 2


def _build_consts(b, t, c, k, dilation, pad):
    """Trace-time numpy constants packed into one (B*T, (k+1)*B*T) tile.

    cols [0, BT)          : same_batch / n        (per-sample mean matmul)
    cols [BT, 2*BT)       : same_batch / (n - 1)  (unbiased variance matmul)
    cols [2*BT, (k+1)*BT) : 0/1 shift-selection matrices for the k-1
                            non-center depthwise taps (they also mask
                            cross-batch leakage of the folded lane axis).
    """
    bt = b * t
    n = c * t
    row = np.arange(bt)[:, None]            # source lane
    col = np.arange(bt)[None, :]            # destination lane
    same = (row // t == col // t).astype(np.float32)
    parts = [same / n, same / (n - 1)]
    for j in range(k):
        s = j * dilation - pad
        if s == 0:
            continue
        tdst = col % t
        sel = (row == col + s) & (tdst + s >= 0) & (tdst + s < t)
        parts.append(sel.astype(np.float32))
    return np.concatenate(parts, axis=1)


def _make_tcn_speaker_kernel(b_sz, t_len, cin, e_dim, c_ch, ksize):
    bt = b_sz * t_len
    ce = cin + e_dim
    # packed per-channel parameter column offsets (see pack_params)
    o_b1, o_g1, o_be1 = ce, ce + 1, ce + 2
    o_bd, o_g2, o_be2, o_wd = ce + 3, ce + 4, ce + 5, ce + 6

    def _gln(y, gamma, beta, sb_n, sb_nm1):
        # GlobalLayerNorm per sample on the folded (C, B*T) layout.
        # sublane reduce (XLU) + single-row matmul per statistic.
        colsum = jnp.sum(y, axis=0, keepdims=True)                      # (1, BT)
        mean = jnp.dot(colsum, sb_n, preferred_element_type=jnp.float32)
        yc = y - mean
        sqcol = jnp.sum(yc * yc, axis=0, keepdims=True)
        var = jnp.dot(sqcol, sb_nm1, preferred_element_type=jnp.float32)
        denom = jnp.sqrt(var) + EPS        # torch: (x - mean) / (std + eps)
        inv = pl.reciprocal(denom, approx=True)   # EUP slot
        inv = inv * (2.0 - denom * inv)           # one Newton step -> ~exact
        return gamma * (yc * inv) + beta

    def kernel(x_ref, aux_ref, const_ref, wc_ref, wo_ref, alpha_ref,
               out_ref, zfold_ref):
        # ---- fold native (B, Cin, T) x and (B*E, 1) aux into (Cin+E, B*T) ----
        xs = []
        for b in range(b_sz):
            lo, hi = b * t_len, (b + 1) * t_len
            xb = x_ref[b]                                    # (Cin, T)
            xs.append(xb)
            zfold_ref[0:cin, lo:hi] = xb
            zfold_ref[cin:ce, lo:hi] = jnp.broadcast_to(
                aux_ref[b * e_dim:(b + 1) * e_dim], (e_dim, t_len))
        z = zfold_ref[...]                                   # (Cin+E, BT)

        # packed trace-time constants
        sb_n = const_ref[:, 0:bt]                            # same_batch / n
        sb_nm1 = const_ref[:, bt:2 * bt]                     # same_batch / (n-1)
        sel = const_ref[:, 2 * bt:(ksize + 1) * bt]          # (BT, (K-1)*BT)

        # ---- 1x1 Conv1d over concat([x, aux]) : one MXU matmul ----
        y = (jnp.dot(wc_ref[:, 0:ce], z, preferred_element_type=jnp.float32)
             + wc_ref[:, o_b1:o_b1 + 1])                     # (C, BT)

        # ---- PReLU 1 (shared scalar, SMEM) + GlobalLayerNorm 1 ----
        a1 = alpha_ref[0]
        y = jnp.where(y >= 0, y, a1 * y)
        y = _gln(y, wc_ref[:, o_g1:o_g1 + 1], wc_ref[:, o_be1:o_be1 + 1],
                 sb_n, sb_nm1)

        # ---- depthwise dilated Conv1d (groups=C, 'same' zero padding) ----
        # all non-center taps gathered with ONE matmul; center tap is y itself
        taps = jnp.dot(y, sel, preferred_element_type=jnp.float32)  # (C,(K-1)*BT)
        mid = ksize // 2
        acc = wc_ref[:, o_wd + mid:o_wd + mid + 1] * y
        side = 0
        for j in range(ksize):
            if j == mid:
                continue
            acc = acc + (wc_ref[:, o_wd + j:o_wd + j + 1]
                         * taps[:, side * bt:(side + 1) * bt])
            side += 1
        y = acc + wc_ref[:, o_bd:o_bd + 1]

        # ---- PReLU 2 + GlobalLayerNorm 2 ----
        a2 = alpha_ref[1]
        y = jnp.where(y >= 0, y, a2 * y)
        y = _gln(y, wc_ref[:, o_g2:o_g2 + 1], wc_ref[:, o_be2:o_be2 + 1],
                 sb_n, sb_nm1)

        # ---- 1x1 Conv1d back to in_channels, then per-sample residual ----
        zo = (jnp.dot(wo_ref[:, 0:c_ch], y, preferred_element_type=jnp.float32)
              + wo_ref[:, c_ch:c_ch + 1])                    # (Cin, BT)
        for b in range(b_sz):
            out_ref[b, :, :] = zo[:, b * t_len:(b + 1) * t_len] + xs[b]

    return kernel


def pack_params(params):
    """One-time weight pre-packing (runs once, off the per-call path)."""
    wc = jnp.concatenate(
        [params["w1x"], params["w1a"], params["b1"], params["g1"],
         params["be1"], params["bd"], params["g2"], params["be2"],
         params["wd"]], axis=1)                              # (C, Cin+E+6+K)
    wo = jnp.concatenate([params["w2"], params["b2"]], axis=1)  # (Cin, C+1)
    alphas = jnp.stack([params["a1"].reshape(()), params["a2"].reshape(())])
    return {"wc": wc, "wo": wo, "alphas": alphas}


def tcn_block_speaker(x, aux, packed):
    B_, Cin, T_ = x.shape
    E = aux.shape[1]
    C = packed["wc"].shape[0]
    # trace-time constant tile (numpy -> embedded literal); lane-dense (BT,128)
    consts = _build_consts(B_, T_, C, KERNEL_SIZE, DILATION, PAD)

    vmem = pl.BlockSpec(memory_space=pltpu.MemorySpace.VMEM)
    smem = pl.BlockSpec(memory_space=pltpu.MemorySpace.SMEM)

    return pl.pallas_call(
        _make_tcn_speaker_kernel(B_, T_, Cin, E, C, KERNEL_SIZE),
        out_shape=jax.ShapeDtypeStruct((B_, Cin, T_), jnp.float32),
        in_specs=[vmem, vmem, vmem, vmem, vmem, smem],
        out_specs=vmem,
        scratch_shapes=[pltpu.VMEM((Cin + E, B_ * T_), jnp.float32)],
        input_output_aliases={0: 0},   # residual output reuses x's buffer
    )(x, aux.reshape(-1, 1), consts, packed["wc"], packed["wo"],
      packed["alphas"])


# ---------------- pure-JAX reference (mirrors the torch forward) ----------------
def _ref_forward(x, aux, params):
    B_, Cin, T_ = x.shape
    E = aux.shape[1]
    aux_e = jnp.broadcast_to(aux[:, :, None], (B_, E, T_))
    y = jnp.concatenate([x, aux_e], axis=1)                       # (B, Cin+E, T)
    w1 = jnp.concatenate([params["w1x"], params["w1a"]], axis=1)  # (C, Cin+E)
    y = jnp.einsum("oc,bct->bot", w1, y) + params["b1"][None]

    def prelu(v, a):
        return jnp.where(v >= 0, v, a[None] * v)

    def gln(v, g, b):
        n = v.shape[1] * v.shape[2]
        mean = jnp.mean(v, axis=(1, 2), keepdims=True)
        var = jnp.sum((v - mean) ** 2, axis=(1, 2), keepdims=True) / (n - 1)
        std = jnp.sqrt(var)                       # torch.std default: unbiased
        return g[None] * ((v - mean) / (std + EPS)) + b[None]

    y = prelu(y, params["a1"])
    y = gln(y, params["g1"], params["be1"])

    C = y.shape[1]
    acc = jnp.zeros_like(y)
    for j in range(KERNEL_SIZE):
        s = j * DILATION - PAD
        if s == 0:
            shifted = y
        elif s > 0:
            shifted = jnp.concatenate(
                [y[:, :, s:], jnp.zeros((B_, C, s), y.dtype)], axis=2)
        else:
            shifted = jnp.concatenate(
                [jnp.zeros((B_, C, -s), y.dtype), y[:, :, :T_ + s]], axis=2)
        acc = acc + params["wd"][None, :, j:j + 1] * shifted
    y = acc + params["bd"][None]

    y = prelu(y, params["a2"])
    y = gln(y, params["g2"], params["be2"])
    y = jnp.einsum("oc,bct->bot", params["w2"], y) + params["b2"][None]
    return y + x


def _init_params(key):
    ks = jax.random.split(key, 11)
    C, Cin, E, K = CONV_CHANNELS, IN_CHANNELS, EMBEDD_DIM, KERNEL_SIZE
    p = {}
    s1 = 1.0 / jnp.sqrt(Cin + E)
    p["w1x"] = jax.random.uniform(ks[0], (C, Cin), jnp.float32, -s1, s1)
    p["w1a"] = jax.random.uniform(ks[1], (C, E), jnp.float32, -s1, s1)
    p["b1"] = jax.random.uniform(ks[2], (C, 1), jnp.float32, -s1, s1)
    p["a1"] = jnp.full((1, 1), 0.25, jnp.float32)        # nn.PReLU default
    p["g1"] = 1.0 + 0.1 * jax.random.normal(ks[3], (C, 1), jnp.float32)
    p["be1"] = 0.1 * jax.random.normal(ks[4], (C, 1), jnp.float32)
    sd = 1.0 / jnp.sqrt(K)                               # depthwise fan_in = K
    p["wd"] = jax.random.uniform(ks[5], (C, K), jnp.float32, -sd, sd)
    p["bd"] = jax.random.uniform(ks[6], (C, 1), jnp.float32, -sd, sd)
    p["a2"] = jnp.full((1, 1), 0.25, jnp.float32)
    p["g2"] = 1.0 + 0.1 * jax.random.normal(ks[7], (C, 1), jnp.float32)
    p["be2"] = 0.1 * jax.random.normal(ks[8], (C, 1), jnp.float32)
    s2 = 1.0 / jnp.sqrt(C)
    p["w2"] = jax.random.uniform(ks[9], (Cin, C), jnp.float32, -s2, s2)
    p["b2"] = jax.random.uniform(ks[10], (Cin, 1), jnp.float32, -s2, s2)
    return p


if __name__ == "__main__":
    key = jax.random.PRNGKey(0)
    kx, ka, kp = jax.random.split(key, 3)
    x = jax.random.normal(kx, (B, IN_CHANNELS, T), jnp.float32)
    aux = jax.random.normal(ka, (B, EMBEDD_DIM), jnp.float32)
    params = _init_params(kp)
    packed = pack_params(params)                 # one-time, off the hot path

    out = jax.jit(tcn_block_speaker)(x, aux, packed)
    out = jax.block_until_ready(out)

    ref = _ref_forward(x, aux, params)
    assert out.shape == (B, IN_CHANNELS, T)
    assert jnp.allclose(out, ref, atol=5e-4, rtol=1e-3), "mismatch vs reference"

    print("KERNEL_OK")
</pallas_src>

<mosaic_0001>
module attributes {stable_mosaic.version = 11 : i64} {
  func.func @kernel(%arg0: memref<2x16x16xf32, #tpu.memory_space<vmem>>, %arg1: memref<16x1xf32, #tpu.memory_space<vmem>>, %arg2: memref<32x128xf32, #tpu.memory_space<vmem>>, %arg3: memref<32x33xf32, #tpu.memory_space<vmem>>, %arg4: memref<16x33xf32, #tpu.memory_space<vmem>>, %arg5: memref<2xf32, #tpu.memory_space<smem>>, %arg6: memref<2x16x16xf32, #tpu.memory_space<vmem>>, %arg7: memref<24x32xf32, #tpu.memory_space<vmem>>) attributes {dimension_semantics = [], scalar_prefetch = 0 : i64, scratch_operands = 1 : i64, tpu.core_type = #tpu.core_type<tc>} {
    %c0 = arith.constant 0 : index
    %c0_0 = arith.constant 0 : index
    %c0_1 = arith.constant 0 : index
    %0 = vector.load %arg0[%c0, %c0_0, %c0_1] : memref<2x16x16xf32, #tpu.memory_space<vmem>>, vector<1x16x16xf32>
    %1 = vector.shape_cast %0 : vector<1x16x16xf32> to vector<16x16xf32>
    %c0_2 = arith.constant 0 : index
    %c0_3 = arith.constant 0 : index
    %2 = vector.load %arg7[%c0_2, %c0_3] : memref<24x32xf32, #tpu.memory_space<vmem>>, vector<16x16xf32>
    tpu.vector_store %arg7[%c0_2, %c0_3], %1 {strides = array<i32>} : memref<24x32xf32, #tpu.memory_space<vmem>>, vector<16x16xf32>,
    %c0_4 = arith.constant 0 : index
    %c0_5 = arith.constant 0 : index
    %3 = vector.load %arg1[%c0_4, %c0_5] : memref<16x1xf32, #tpu.memory_space<vmem>>, vector<8x1xf32>
    %4 = vector.shape_cast %3 : vector<8x1xf32> to vector<8x1xf32>
    %5 = vector.broadcast %4 : vector<8x1xf32> to vector<8x16xf32>
    %c16 = arith.constant 16 : index
    %c0_6 = arith.constant 0 : index
    %6 = vector.load %arg7[%c16, %c0_6] : memref<24x32xf32, #tpu.memory_space<vmem>>, vector<8x16xf32>
    tpu.vector_store %arg7[%c16, %c0_6], %5 {strides = array<i32>} : memref<24x32xf32, #tpu.memory_space<vmem>>, vector<8x16xf32>,
    %c1 = arith.constant 1 : index
    %c0_7 = arith.constant 0 : index
    %c0_8 = arith.constant 0 : index
    %7 = vector.load %arg0[%c1, %c0_7, %c0_8] : memref<2x16x16xf32, #tpu.memory_space<vmem>>, vector<1x16x16xf32>
    %8 = vector.shape_cast %7 : vector<1x16x16xf32> to vector<16x16xf32>
    %c0_9 = arith.constant 0 : index
    %c16_10 = arith.constant 16 : index
    %9 = vector.load %arg7[%c0_9, %c16_10] : memref<24x32xf32, #tpu.memory_space<vmem>>, vector<16x16xf32>
    tpu.vector_store %arg7[%c0_9, %c16_10], %8 {strides = array<i32>} : memref<24x32xf32, #tpu.memory_space<vmem>>, vector<16x16xf32>,
    %c8 = arith.constant 8 : index
    %c0_11 = arith.constant 0 : index
    %10 = vector.load %arg1[%c8, %c0_11] : memref<16x1xf32, #tpu.memory_space<vmem>>, vector<8x1xf32>
    %11 = vector.shape_cast %10 : vector<8x1xf32> to vector<8x1xf32>
    %12 = vector.broadcast %11 : vector<8x1xf32> to vector<8x16xf32>
    %c16_12 = arith.constant 16 : index
    %c16_13 = arith.constant 16 : index
    %13 = vector.load %arg7[%c16_12, %c16_13] : memref<24x32xf32, #tpu.memory_space<vmem>>, vector<8x16xf32>
    tpu.vector_store %arg7[%c16_12, %c16_13], %12 {strides = array<i32>} : memref<24x32xf32, #tpu.memory_space<vmem>>, vector<8x16xf32>,
    %c0_14 = arith.constant 0 : index
    %c0_15 = arith.constant 0 : index
    %14 = vector.load %arg7[%c0_14, %c0_15] : memref<24x32xf32, #tpu.memory_space<vmem>>, vector<24x32xf32>
    %c0_16 = arith.constant 0 : index
    %c0_17 = arith.constant 0 : index
    %15 = vector.load %arg2[%c0_16, %c0_17] : memref<32x128xf32, #tpu.memory_space<vmem>>, vector<32x32xf32>
    %c0_18 = arith.constant 0 : index
    %c32 = arith.constant 32 : index
    %16 = vector.load %arg2[%c0_18, %c32] : memref<32x128xf32, #tpu.memory_space<vmem>>, vector<32x32xf32>
    %c0_19 = arith.constant 0 : index
    %c64 = arith.constant 64 : index
    %17 = vector.load %arg2[%c0_19, %c64] : memref<32x128xf32, #tpu.memory_space<vmem>>, vector<32x64xf32>
    %c0_20 = arith.constant 0 : index
    %c0_21 = arith.constant 0 : index
    %18 = vector.load %arg3[%c0_20, %c0_21] : memref<32x33xf32, #tpu.memory_space<vmem>>, vector<32x24xf32>
    %cst = arith.constant dense<0.000000e+00> : vector<32x32xf32>
    %19 = tpu.matmul %18, %14, %cst {dimension_numbers = #tpu.dot_dimension_numbers<[1], [0], [0], [1], [0, 0, 1, 1], [], []>} : vector<32x24xf32>, vector<24x32xf32>, vector<32x32xf32> -> vector<32x32xf32>
    %c0_22 = arith.constant 0 : index
    %c24 = arith.constant 24 : index
    %20 = vector.load %arg3[%c0_22, %c24] : memref<32x33xf32, #tpu.memory_space<vmem>>, vector<32x1xf32>
    %21 = vector.broadcast %20 : vector<32x1xf32> to vector<32x32xf32>
    %22 = arith.addf %19, %21 : vector<32x32xf32>
    %c0_23 = arith.constant 0 : index
    %23 = memref.load %arg5[%c0_23] : memref<2xf32, #tpu.memory_space<smem>>
    %cst_24 = arith.constant 0.000000e+00 : f32
    %24 = vector.broadcast %cst_24 : f32 to vector<32x32xf32>
    %25 = arith.cmpf oge, %22, %24 : vector<32x32xf32>
    %26 = vector.broadcast %23 : f32 to vector<32x32xf32>
    %27 = arith.mulf %26, %22 : vector<32x32xf32>
    %28 = arith.select %25, %22, %27 : vector<32x32xi1>, vector<32x32xf32>
    %c0_25 = arith.constant 0 : index
    %c25 = arith.constant 25 : index
    %29 = vector.load %arg3[%c0_25, %c25] : memref<32x33xf32, #tpu.memory_space<vmem>>, vector<32x1xf32>
    %c0_26 = arith.constant 0 : index
    %c26 = arith.constant 26 : index
    %30 = vector.load %arg3[%c0_26, %c26] : memref<32x33xf32, #tpu.memory_space<vmem>>, vector<32x1xf32>
    %cst_27 = arith.constant dense<0.000000e+00> : vector<32xf32>
    %31 = vector.multi_reduction <add>, %28, %cst_27 [0] : vector<32x32xf32> to vector<32xf32>
    %32 = vector.shape_cast %31 : vector<32xf32> to vector<1x32xf32>
    %cst_28 = arith.constant dense<0.000000e+00> : vector<1x32xf32>
    %33 = tpu.matmul %32, %15, %cst_28 {dimension_numbers = #tpu.dot_dimension_numbers<[1], [0], [0], [1], [0, 0, 1, 1], [], []>} : vector<1x32xf32>, vector<32x32xf32>, vector<1x32xf32> -> vector<1x32xf32>
    %34 = vector.broadcast %33 : vector<1x32xf32> to vector<32x32xf32>
    %35 = arith.subf %28, %34 : vector<32x32xf32>
    %36 = arith.mulf %35, %35 : vector<32x32xf32>
    %cst_29 = arith.constant dense<0.000000e+00> : vector<32xf32>
    %37 = vector.multi_reduction <add>, %36, %cst_29 [0] : vector<32x32xf32> to vector<32xf32>
    %38 = vector.shape_cast %37 : vector<32xf32> to vector<1x32xf32>
    %cst_30 = arith.constant dense<0.000000e+00> : vector<1x32xf32>
    %39 = tpu.matmul %38, %16, %cst_30 {dimension_numbers = #tpu.dot_dimension_numbers<[1], [0], [0], [1], [0, 0, 1, 1], [], []>} : vector<1x32xf32>, vector<32x32xf32>, vector<1x32xf32> -> vector<1x32xf32>
    %40 = math.sqrt %39 : vector<1x32xf32>
    %cst_31 = arith.constant 9.99999974E-6 : f32
    %41 = vector.broadcast %cst_31 : f32 to vector<1x32xf32>
    %42 = arith.addf %40, %41 : vector<1x32xf32>
    %43 = tpu.reciprocal %42 {approx = true} : vector<1x32xf32> -> vector<1x32xf32>
    %44 = arith.mulf %42, %43 : vector<1x32xf32>
    %cst_32 = arith.constant 2.000000e+00 : f32
    %45 = vector.broadcast %cst_32 : f32 to vector<1x32xf32>
    %46 = arith.subf %45, %44 : vector<1x32xf32>
    %47 = arith.mulf %43, %46 : vector<1x32xf32>
    %48 = vector.broadcast %47 : vector<1x32xf32> to vector<32x32xf32>
    %49 = arith.mulf %35, %48 : vector<32x32xf32>
    %50 = vector.broadcast %29 : vector<32x1xf32> to vector<32x32xf32>
    %51 = arith.mulf %50, %49 : vector<32x32xf32>
    %52 = vector.broadcast %30 : vector<32x1xf32> to vector<32x32xf32>
    %53 = arith.addf %51, %52 : vector<32x32xf32>
    %cst_33 = arith.constant dense<0.000000e+00> : vector<32x64xf32>
    %54 = tpu.matmul %53, %17, %cst_33 {dimension_numbers = #tpu.dot_dimension_numbers<[1], [0], [0], [1], [0, 0, 1, 1], [], []>} : vector<32x32xf32>, vector<32x64xf32>, vector<32x64xf32> -> vector<32x64xf32>
    %c0_34 = arith.constant 0 : index
    %c31 = arith.constant 31 : index
    %55 = vector.load %arg3[%c0_34, %c31] : memref<32x33xf32, #tpu.memory_space<vmem>>, vector<32x1xf32>
    %56 = vector.broadcast %55 : vector<32x1xf32> to vector<32x32xf32>
    %57 = arith.mulf %56, %53 : vector<32x32xf32>
    %c0_35 = arith.constant 0 : index
    %c30 = arith.constant 30 : index
    %58 = vector.load %arg3[%c0_35, %c30] : memref<32x33xf32, #tpu.memory_space<vmem>>, vector<32x1xf32>
    %59 = vector.extract_strided_slice %54 {offsets = [0, 0], sizes = [32, 32], strides = [1, 1]} : vector<32x64xf32> to vector<32x32xf32>
    %60 = vector.broadcast %58 : vector<32x1xf32> to vector<32x32xf32>
    %61 = arith.mulf %60, %59 : vector<32x32xf32>
    %62 = arith.addf %57, %61 : vector<32x32xf32>
    %c0_36 = arith.constant 0 : index
    %c32_37 = arith.constant 32 : index
    %63 = vector.load %arg3[%c0_36, %c32_37] : memref<32x33xf32, #tpu.memory_space<vmem>>, vector<32x1xf32>
    %64 = vector.extract_strided_slice %54 {offsets = [0, 32], sizes = [32, 32], strides = [1, 1]} : vector<32x64xf32> to vector<32x32xf32>
    %65 = vector.broadcast %63 : vector<32x1xf32> to vector<32x32xf32>
    %66 = arith.mulf %65, %64 : vector<32x32xf32>
    %67 = arith.addf %62, %66 : vector<32x32xf32>
    %c0_38 = arith.constant 0 : index
    %c27 = arith.constant 27 : index
    %68 = vector.load %arg3[%c0_38, %c27] : memref<32x33xf32, #tpu.memory_space<vmem>>, vector<32x1xf32>
    %69 = vector.broadcast %68 : vector<32x1xf32> to vector<32x32xf32>
    %70 = arith.addf %67, %69 : vector<32x32xf32>
    %c1_39 = arith.constant 1 : index
    %71 = memref.load %arg5[%c1_39] : memref<2xf32, #tpu.memory_space<smem>>
    %cst_40 = arith.constant 0.000000e+00 : f32
    %72 = vector.broadcast %cst_40 : f32 to vector<32x32xf32>
    %73 = arith.cmpf oge, %70, %72 : vector<32x32xf32>
    %74 = vector.broadcast %71 : f32 to vector<32x32xf32>
    %75 = arith.mulf %74, %70 : vector<32x32xf32>
    %76 = arith.select %73, %70, %75 : vector<32x32xi1>, vector<32x32xf32>
    %c0_41 = arith.constant 0 : index
    %c28 = arith.constant 28 : index
    %77 = vector.load %arg3[%c0_41, %c28] : memref<32x33xf32, #tpu.memory_space<vmem>>, vector<32x1xf32>
    %c0_42 = arith.constant 0 : index
    %c29 = arith.constant 29 : index
    %78 = vector.load %arg3[%c0_42, %c29] : memref<32x33xf32, #tpu.memory_space<vmem>>, vector<32x1xf32>
    %cst_43 = arith.constant dense<0.000000e+00> : vector<32xf32>
    %79 = vector.multi_reduction <add>, %76, %cst_43 [0] : vector<32x32xf32> to vector<32xf32>
    %80 = vector.shape_cast %79 : vector<32xf32> to vector<1x32xf32>
    %cst_44 = arith.constant dense<0.000000e+00> : vector<1x32xf32>
    %81 = tpu.matmul %80, %15, %cst_44 {dimension_numbers = #tpu.dot_dimension_numbers<[1], [0], [0], [1], [0, 0, 1, 1], [], []>} : vector<1x32xf32>, vector<32x32xf32>, vector<1x32xf32> -> vector<1x32xf32>
    %82 = vector.broadcast %81 : vector<1x32xf32> to vector<32x32xf32>
    %83 = arith.subf %76, %82 : vector<32x32xf32>
    %84 = arith.mulf %83, %83 : vector<32x32xf32>
    %cst_45 = arith.constant dense<0.000000e+00> : vector<32xf32>
    %85 = vector.multi_reduction <add>, %84, %cst_45 [0] : vector<32x32xf32> to vector<32xf32>
    %86 = vector.shape_cast %85 : vector<32xf32> to vector<1x32xf32>
    %cst_46 = arith.constant dense<0.000000e+00> : vector<1x32xf32>
    %87 = tpu.matmul %86, %16, %cst_46 {dimension_numbers = #tpu.dot_dimension_numbers<[1], [0], [0], [1], [0, 0, 1, 1], [], []>} : vector<1x32xf32>, vector<32x32xf32>, vector<1x32xf32> -> vector<1x32xf32>
    %88 = math.sqrt %87 : vector<1x32xf32>
    %cst_47 = arith.constant 9.99999974E-6 : f32
    %89 = vector.broadcast %cst_47 : f32 to vector<1x32xf32>
    %90 = arith.addf %88, %89 : vector<1x32xf32>
    %91 = tpu.reciprocal %90 {approx = true} : vector<1x32xf32> -> vector<1x32xf32>
    %92 = arith.mulf %90, %91 : vector<1x32xf32>
    %cst_48 = arith.constant 2.000000e+00 : f32
    %93 = vector.broadcast %cst_48 : f32 to vector<1x32xf32>
    %94 = arith.subf %93, %92 : vector<1x32xf32>
    %95 = arith.mulf %91, %94 : vector<1x32xf32>
    %96 = vector.broadcast %95 : vector<1x32xf32> to vector<32x32xf32>
    %97 = arith.mulf %83, %96 : vector<32x32xf32>
    %98 = vector.broadcast %77 : vector<32x1xf32> to vector<32x32xf32>
    %99 = arith.mulf %98, %97 : vector<32x32xf32>
    %100 = vector.broadcast %78 : vector<32x1xf32> to vector<32x32xf32>
    %101 = arith.addf %99, %100 : vector<32x32xf32>
    %c0_49 = arith.constant 0 : index
    %c0_50 = arith.constant 0 : index
    %102 = vector.load %arg4[%c0_49, %c0_50] : memref<16x33xf32, #tpu.memory_space<vmem>>, vector<16x32xf32>
    %cst_51 = arith.constant dense<0.000000e+00> : vector<16x32xf32>
    %103 = tpu.matmul %102, %101, %cst_51 {dimension_numbers = #tpu.dot_dimension_numbers<[1], [0], [0], [1], [0, 0, 1, 1], [], []>} : vector<16x32xf32>, vector<32x32xf32>, vector<16x32xf32> -> vector<16x32xf32>
    %c0_52 = arith.constant 0 : index
    %c32_53 = arith.constant 32 : index
    %104 = vector.load %arg4[%c0_52, %c32_53] : memref<16x33xf32, #tpu.memory_space<vmem>>, vector<16x1xf32>
    %105 = vector.broadcast %104 : vector<16x1xf32> to vector<16x32xf32>
    %106 = arith.addf %103, %105 : vector<16x32xf32>
    %107 = vector.extract_strided_slice %106 {offsets = [0, 0], sizes = [16, 16], strides = [1, 1]} : vector<16x32xf32> to vector<16x16xf32>
    %108 = arith.addf %107, %1 : vector<16x16xf32>
    %c0_54 = arith.constant 0 : index
    %c0_55 = arith.constant 0 : index
    %c0_56 = arith.constant 0 : index
    %109 = vector.load %arg6[%c0_54, %c0_55, %c0_56] : memref<2x16x16xf32, #tpu.memory_space<vmem>>, vector<1x16x16xf32>
    %110 = vector.shape_cast %109 : vector<1x16x16xf32> to vector<16x16xf32>
    %111 = vector.shape_cast %108 : vector<16x16xf32> to vector<1x16x16xf32>
    tpu.vector_store %arg6[%c0_54, %c0_55, %c0_56], %111 {strides = array<i32>} : memref<2x16x16xf32, #tpu.memory_space<vmem>>, vector<1x16x16xf32>,
    %112 = vector.extract_strided_slice %106 {offsets = [0, 16], sizes = [16, 16], strides = [1, 1]} : vector<16x32xf32> to vector<16x16xf32>
    %113 = arith.addf %112, %8 : vector<16x16xf32>
    %c1_57 = arith.constant 1 : index
    %c0_58 = arith.constant 0 : index
    %c0_59 = arith.constant 0 : index
    %114 = vector.load %arg6[%c1_57, %c0_58, %c0_59] : memref<2x16x16xf32, #tpu.memory_space<vmem>>, vector<1x16x16xf32>
    %115 = vector.shape_cast %114 : vector<1x16x16xf32> to vector<16x16xf32>
    %116 = vector.shape_cast %113 : vector<16x16xf32> to vector<1x16x16xf32>
    tpu.vector_store %arg6[%c1_57, %c0_58, %c0_59], %116 {strides = array<i32>} : memref<2x16x16xf32, #tpu.memory_space<vmem>>, vector<1x16x16xf32>,
    return
  }
}

</mosaic_0001>

<bundles_post_ra>
// kernel: tcn_block_speaker.1
= control target key start
LH: loop header
LB: loop body
LE: loop exit
PB: predicated region body
PF: predicated region fallthrough
CT: control target
= control target key end

     0   :  { %11 = vsyncpa [#allocation4], 0  ;;  %s1719_s0 = inlined_call_operand.hbm [shape: f32[2,16,16], index: 0, kind: input, shape index: {}, may-alias: {0,6}]   ;;  %s1720_s1 = inlined_call_operand.vmem [shape: f32[16,1], index: 1, kind: input, shape index: {}]   ;;  %s1721_s2 = inlined_call_operand.vmem [shape: f32[32,128], index: 2, kind: input, shape index: {}]   ;;  %s1722_s3 = inlined_call_operand.vmem [shape: f32[32,33], index: 3, kind: input, shape index: {}]   ;;  %s1723_s4 = inlined_call_operand.vmem [shape: f32[16,33], index: 4, kind: input, shape index: {}]   ;;  %s1724_s5 = inlined_call_operand.vmem [shape: f32[2], index: 5, kind: input, shape index: {}]   ;;  %s1725_s6 = inlined_call_operand.hbm [shape: f32[2,16,16], index: 6, kind: output, shape index: {}, may-alias: {0,6}]  }
   0x1   :  { %12 = vsyncpa [#allocation6], 0 }
   0x2   :  { %13 = vsyncpa [#allocation5], 0  ;;  %s1400_s21 = smov [#allocation3]   ;;  %s40_s25 = sshll.u32 %s1724_s5, 4  ;;  %s41_s25 = int_to_ptr.vmem [resolvable:$true] %s40_s25 }
   0x3   :  { %s19_s22 = sshll.u32 %s1400_s21, 4  ;;  %s1338_s28 = scalar_lea.hbm %s1719_s0, 512  ;;  %s20_s22 = int_to_ptr.vmem [resolvable:$true] %s19_s22 }
   0x4   :  { %p1339_p0 = scmp.ne.s32.totalorder %s1719_s0, %s1338_s28  ;;  %p1342_p1 = scmp.lt.u32.totalorder %s1338_s28, %s1719_s0 }
   0x6   :  { %p1344_p2 = pnand %p1342_p1, %p1339_p0 }
   0x8   :  { %1347 = shalt.err (!%p1344_p2)
}
   0x9   :  { %s1348_s9 = scalar_lea.vmem %s20_s22, 512  ;;  %p1353_p4 = scmp.lt.s32.totalorder %s20_s22, %s20_s22 }
   0xa   :  { %p1349_p3 = scmp.ne.s32.totalorder %s20_s22, %s1348_s9  ;;  %p1354_p5 = scmp.lt.s32.totalorder %s1348_s9, %s1348_s9 }
   0xc   :  { %p1355_p6 = por %p1354_p5, %p1353_p4 }
   0xe   :  { %p1356_p7 = pnand %p1355_p6, %p1349_p3 }
  0x10   :  { %1359 = shalt.err (!%p1356_p7)
}
  0x11   :  { %s1401_s5 = smov 128   ;;  %s1402_s10 = smov 8  }
  0x12   :  { %25 = dma.hbm_to_vmem [thread:$0]  %s1719_s0, 512, %s20_s22, [#allocation4], %s1401_s5, %s1401_s5, %s1402_s10  }
  0x13   :  { %s1360_s13 = scalar_lea.vmem %s41_s25, 16  ;;  %p1365_p9 = scmp.lt.s32.totalorder %s41_s25, %s41_s25 }
  0x14   :  { %p1361_p8 = scmp.ne.s32.totalorder %s41_s25, %s1360_s13  ;;  %p1366_p10 = scmp.lt.s32.totalorder %s1360_s13, %s1360_s13 }
  0x16   :  { %p1367_p11 = por %p1366_p10, %p1365_p9 }
  0x18   :  { %p1368_p12 = pnand %p1367_p11, %p1361_p8 }
  0x1a   :  { %1371 = shalt.err (!%p1368_p12)
}
  0x1b   :  { %s1403_s14 = smov [#allocation7]  }
  0x1c   :  { %43 = dma.vmem_to_smem %s41_s25, 16, %s1403_s14, [#allocation6]  }
  0x1d   :  { %1394 = dma.done.wait [#allocation4], 512  }
  0x1e   :  { %1395 = vsyncadd [#allocation4], 4294966784 }
  0x1f   :  { %1396 = dma.done.wait [#allocation6], 16  }
  0x20   :  { %1397 = vsyncadd [#allocation6], 4294967280 }
  0x21   :  { %50 = sfence }
  0x22   :  { %v56_v0 = vld [vmem:[%s1720_s1] sm:$0xff]  ;;  %v64_v1 = vld [vmem:[#allocation3 + $0x10] sm:$0xff]  ;;  %v1404_v2 = vmov 0   ;;  %s1405_s0 = smov 16   ;;  %v1478_v3 = vld [vmem:[#allocation3] sm:$0xff]  ;;  %vm53_vm0 = vcmask 130048  }
  0x23   :  { %1284 = vset.pattern.permute.xlu0 %v1404_v2  ;;  %68 = vrot.lane.b32.xlu1 %v64_v1, %s1405_s0  ;;  %v1480_v4 = vld [vmem:[#allocation3 + $0x8] sm:$0xff]  ;;  %v65_v5 = vld [vmem:[#allocation3 + $0x18] sm:$0xff]  ;;  %54 = vst.msk [vmem:[#allocation2] sm:$0xff] %vm53_vm0, %v1478_v3  ;;  %v77_v6 = vld [vmem:[%s1720_s1 + $0x8] sm:$0xff]  ;;  %vm115_vm1 = vcmask 195584   ;;  %v1406_v9 = vmov 24  }
  0x24   :  { %59 = vperm.xlu0 %1284, %v56_v0   ;;  %55 = vst.msk [vmem:[#allocation2 + $0x8] sm:$0xff] %vm53_vm0, %v1480_v4  ;;  %v1492_v7 = vld [vmem:[%s1722_s3] sm:$0xff]  ;;  %v1499_v8 = vld [vmem:[%s1722_s3 + $0x8] sm:$0xff]  ;;  %1286 = vset.pattern.permute.xlu1 %v1406_v9  ;;  %v1506_v10 = vld [vmem:[%s1722_s3 + $0x10] sm:$0xff]  ;;  %vm74_vm2 = vcmask 261248   ;;  %v1407_v23 = vmov 0.0|0.0  }
  0x25   :  { %1143 = vmatprep.mubr.msk.f32.mxu0 %vm115_vm1, %v1492_v7  ;;  %v1511_v11 = vld [vmem:[%s1722_s3 + $0x18] sm:$0xff]  ;;  %v87_v20 = vld [vmem:[%s1721_s2] sm:$0xff]  ;;  %v88_v21 = vld [vmem:[%s1721_s2 + $0x8] sm:$0xff]  ;;  %1222 = vmatprep.subr.bf16.mxu1 %v1407_v23  ;;  %vm1408_vm3 = vmmov 0   ;;  %v1409_v26 = vmov 0.0   ;;  %s209_s9 = sld [smem:[#allocation7]] }
  0x26   :  { %v89_v22 = vld [vmem:[%s1721_s2 + $0x10] sm:$0xff]  ;;  %v1538_v24 = vpack.c.bf16 %v88_v21, %v87_v20  ;;  %v90_v25 = vld [vmem:[%s1721_s2 + $0x18] sm:$0xff]  ;;  %1157 = vmatprep.mubr.msk.f32.mxu1 %vm1408_vm3, %v1409_v26  ;;  %v1553_v28 = vpack.i.bf16 %v88_v21, %v87_v20  ;;  %s1410_s2 = smov 96   ;;  %vm223_vm5 = vcmask 261120   ;;  %s1413_s11 = smov 64   ;;  %v1416_v20 = vmov 31  }
  0x27   :  { %70 = vrot.lane.b32.xlu1 %v65_v5, %s1405_s0  ;;  %v1549_v27 = vpack.c.bf16 %v90_v25, %v89_v22  ;;  %v1555_v29 = vpack.i.bf16 %v90_v25, %v89_v22  ;;  %v310_v21 = vlaneseq  ;;  %s1091_s12 = sld [smem:[#allocation7 + $0x1]]  ;;  %s1421_s0 = smov [#allocation8]  }
  0x28   :  { %80 = vperm.xlu0 %1284, %v77_v6   ;;  %1224 = vmatpush3.bf16.msra.mxu1 %v1538_v24  ;;  %s1068_s17 = sshll.u32 %s1421_s0, 4  ;;  %s1069_s17 = int_to_ptr.vmem [resolvable:$true] %s1068_s17 }
  0x29   :  { %1225 = vmatprep.subr.bf16.mxu1 %v1407_v23  ;;  %v311_v22 = vshrl.u32 %v310_v21, 7  ;;  %s1372_s18 = scalar_lea.vmem %s1069_s17, 512  ;;  %p1377_p0 = scmp.lt.s32.totalorder %s1069_s17, %s1069_s17 }
  0x2a   :  { %p1373_p13 = scmp.ne.s32.totalorder %s1069_s17, %s1372_s18  ;;  %p1378_p1 = scmp.lt.s32.totalorder %s1372_s18, %s1372_s18 }
  0x2b   :  { %102 = vperm.xlu1 %1286, %v1499_v8   ;;  %v214_v33 = vstv %s209_s9  ;;  %v1610_v25 = vsub.s32 0, %v311_v22 }
  0x2c   :  { %1285 = vset.pattern.permute.xlu0 %v1406_v9  ;;  %1227 = vmatpush3.bf16.msra.mxu1 %v1549_v27  ;;  %p1379_p2 = por %p1378_p1, %p1377_p0 }
  0x2d   :  { %97 = vperm.xlu0 %1285, %v1492_v7  }
  0x2e   :  { %p1380_p3 = pnand %p1379_p2, %p1373_p13 }
  0x2f   :  { %107 = vperm.xlu1 %1286, %v1506_v10  }
  0x31   :  { %112 = vperm.xlu0 %1285, %v1511_v11  }
  0x33   :  { %1288 = vrot.lane.b32.xlu1 %v1553_v28, %s1410_s2 }
  0x35   :  { %1293 = vrot.lane.b32.xlu0 %v1555_v29, %s1410_s2 }
  0x95   :  { %v1515_v12 = vpop.permute.xlu1 %68 }
  0x96   :  { %75 = vst.msk [vmem:[#allocation2] sm:$0xff] %vm74_vm2, %v1515_v12 }
  0x99   :  { %v1518_v13 = vpop.permute.xlu1 %70 }
  0x9a   :  { %76 = vst.msk [vmem:[#allocation2 + $0x8] sm:$0xff] %vm74_vm2, %v1518_v13 }
  0x9d   :  { %v84_v14 = vld [vmem:[#allocation2] sm:$0xff] }
  0xa1   :  { %v85_v15 = vld [vmem:[#allocation2 + $0x8] sm:$0xff] }
  0xa2   :  { %v1218_v16 = vpack.c.bf16 %v85_v15, %v84_v14 }
  0xa3   :  { %v60_v17 = vpop.permute.xlu0 %59 }
  0xa4   :  { %62 = vst.msk [vmem:[#allocation2 + $0x10] sm:$0xff] %vm53_vm0, %v60_v17  ;;  %1219 = vmatprep.subr.bf16.mxu0 %v1218_v16  ;;  %v1412_v17 = vmov 26  }
  0xa5   :  { %1221 = vmatpush3.bf16.msra.mxu0 %v1218_v16  ;;  %v1411_v16 = vmov 25  }
  0xa6   :  { %1297 = vset.pattern.permute.xlu1 %v1411_v16  ;;  %1298 = vset.pattern.permute.xlu0 %v1411_v16 }
  0xa7   :  { %v81_v18 = vpop.permute.xlu0 %80  ;;  %445 = vperm.xlu1 %1297, %v1492_v7   ;;  %449 = vperm.xlu0 %1298, %v1499_v8  }
  0xa8   :  { %83 = vst.msk [vmem:[#allocation2 + $0x10] sm:$0xff] %vm74_vm2, %v81_v18  ;;  %v1414_v18 = vmov 32  }
  0xaa   :  { %v103_v31 = vpop.permute.xlu1 %102 }
  0xab   :  { %1299 = vset.pattern.permute.xlu1 %v1412_v17  ;;  %1305 = vset.pattern.permute.xlu0 %v1412_v17 }
  0xac   :  { %v98_v30 = vpop.permute.xlu0 %97  ;;  %465 = vperm.xlu1 %1299, %v1492_v7   ;;  %469 = vperm.xlu0 %1305, %v1499_v8  }
  0xae   :  { %v108_v42 = vpop.permute.xlu1 %107 }
  0xaf   :  { %v86_v19 = vld [vmem:[#allocation2 + $0x10] sm:$0xff] }
  0xb0   :  { %1141 = vmatprep.subr.mxu0 %v86_v19  ;;  %v113_v37 = vpop.permute.xlu0 %112  ;;  %1301 = vrot.lane.b32.xlu1 %v1553_v28, %s1413_s11 }
  0xb1   :  { %1142 = vmatpush3.msra.mxu0 %v86_v19  ;;  %473 = vperm.xlu0 %1305, %v1506_v10   ;;  %v1415_v19 = vmov 30  }
  0xb2   :  { %1144 = vmatmul.mubr.msk.f32.vlgmr.msra.gmra.mrb[0].mxu0 %vm115_vm1, %v1499_v8  ;;  %1228 = vmatprep.subr.bf16.mxu0 %v1407_v23  ;;  %v1289_v0 = vpop.permute.xlu1 %1288 }
  0xb3   :  { %1146 = vmatprep.mubr.msk.f32.mxu0 %vm115_vm1, %v1506_v10  ;;  %v1291_v1 = vunpack.i.h.bf16 %v1289_v0  ;;  %v1290_v2 = vunpack.i.l.bf16 %v1289_v0  ;;  %1306 = vset.pattern.permute.xlu1 %v1411_v16 }
  0xb4   :  { %v1294_v6 = vpop.permute.xlu0 %1293  ;;  %453 = vperm.xlu1 %1306, %v1506_v10  }
  0xb5   :  { %v1578_v5 = vpack.c.bf16 %v1291_v1, %v1290_v2  ;;  %v1296_v9 = vunpack.i.h.bf16 %v1294_v6  ;;  %v1295_v14 = vunpack.i.l.bf16 %v1294_v6  ;;  %477 = vperm.xlu0 %1305, %v1511_v11  }
  0xb6   :  { %1147 = vmatmul.mubr.msk.f32.gmra.mrb[2].mxu0 %vm115_vm1, %v1511_v11 }
  0xb7   :  { %1168 = vmatprep.mubr.msk.f32.mxu0 %vm1408_vm3, %v1409_v26  ;;  %1230 = vmatpush3.bf16.msra.mxu0 %v1578_v5  ;;  %v1582_v15 = vpack.c.bf16 %v1296_v9, %v1295_v14 }
  0xb8   :  { %1231 = vmatprep.subr.bf16.mxu0 %v1407_v23  ;;  %457 = vperm.xlu1 %1306, %v1511_v11  }
  0xb9   :  { %1313 = vset.pattern.permute.xlu0 %v1414_v18 }
  0xba   :  { %642 = vperm.xlu0 %1313, %v1499_v8  }
  0xbb   :  { %1233 = vmatpush3.bf16.msra.mxu0 %v1582_v15 }
  0xbc   :  { %1242 = vmatprep.subr.bf16.mxu0 %v1407_v23  ;;  %1308 = vrot.lane.b32.xlu1 %v1555_v29, %s1413_s11 }
  0xbd   :  { %1312 = vset.pattern.permute.xlu1 %v1414_v18 }
  0xbe   :  { %1316 = vset.pattern.permute.xlu0 %v1415_v19 }
  0xbf   :  { %618 = vperm.xlu0 %1316, %v1499_v8  }
  0xc0   :  { %638 = vperm.xlu1 %1312, %v1492_v7  }
  0xc3   :  { %1317 = vset.pattern.permute.xlu0 %v1416_v20 }
  0xc4   :  { %594 = vperm.xlu0 %1317, %v1492_v7   ;;  %646 = vperm.xlu1 %1312, %v1506_v10  }
  0xc8   :  { %606 = vperm.xlu0 %1317, %v1511_v11   ;;  %650 = vperm.xlu1 %1312, %v1511_v11  }
  0xcc   :  { %1314 = vset.pattern.permute.xlu1 %v1416_v20 }
  0xcd   :  { %598 = vperm.xlu1 %1314, %v1499_v8  }
  0xd1   :  { %1315 = vset.pattern.permute.xlu1 %v1415_v19 }
  0xd2   :  { %614 = vperm.xlu1 %1315, %v1492_v7  }
  0xd6   :  { %1318 = vset.pattern.permute.xlu1 %v1416_v20 }
  0xd7   :  { %602 = vperm.xlu1 %1318, %v1506_v10  }
  0xdb   :  { %1319 = vset.pattern.permute.xlu1 %v1415_v19 }
  0xdc   :  { %622 = vperm.xlu1 %1319, %v1506_v10  }
  0xe0   :  { %626 = vperm.xlu1 %1319, %v1511_v11  }
 0x126   :  { %v450_v17 = vpop.permute.xlu0 %449 }
 0x185   :  { %v1145_v32 = vpop.f32.mrb[0].mxu0 }
 0x186   :  { %v196_v34 = vadd.f32 %v1145_v32, %v103_v31  ;;  %v190_v35 = vpop.f32.mrb[1].mxu0 }
 0x187   :  { %v191_v36 = vadd.f32 %v190_v35, %v98_v30 }
 0x188   :  { %vm211_vm4 = vcmp.ge.f32.partialorder %v196_v34, 0.0  ;;  %v216_v38 = vmul.f32 %v214_v33, %v196_v34 }
 0x189   :  { %vm210_vm6 = vcmp.ge.f32.partialorder %v191_v36, 0.0  ;;  %v215_v39 = vmul.f32 %v214_v33, %v191_v36  ;;  %v1148_v40 = vpop.f32.mrb[2].mxu0 }
 0x18a   :  { %v1561_v41 = vsel %vm211_vm4, %v196_v34, %v216_v38  ;;  %v206_v43 = vadd.f32 %v1148_v40, %v113_v37  ;;  %v200_v44 = vpop.f32.mrb[3].mxu0 }
 0x18b   :  { %v1563_v45 = vsel %vm210_vm6, %v191_v36, %v215_v39  ;;  %v201_v46 = vadd.f32 %v200_v44, %v108_v42  ;;  %v225_v47 = vsel %vm223_vm5, %v1561_v41, 0.0 }
 0x18c   :  { %v224_v48 = vsel %vm223_vm5, %v1563_v45, 0.0  ;;  %vm213_vm7 = vcmp.ge.f32.partialorder %v206_v43, 0.0  ;;  %v218_v49 = vmul.f32 %v214_v33, %v206_v43 }
 0x18d   :  { %vm212_vm8 = vcmp.ge.f32.partialorder %v201_v46, 0.0  ;;  %v217_v50 = vmul.f32 %v214_v33, %v201_v46  ;;  %v226_v51 = vadd.f32 %v225_v47, %v224_v48 }
 0x18e   :  { %v1569_v52 = vsel %vm213_vm7, %v206_v43, %v218_v49 }
 0x18f   :  { %v1571_v53 = vsel %vm212_vm8, %v201_v46, %v217_v50  ;;  %v229_v56 = vsel %vm223_vm5, %v1569_v52, 0.0 }
 0x190   :  { %v227_v54 = vsel %vm223_vm5, %v1571_v53, 0.0 }
 0x191   :  { %v228_v55 = vadd.f32 %v227_v54, %v226_v51 }
 0x193   :  { %v230_v57 = vadd.f32 %v229_v56, %v228_v55 }
 0x195   :  { %v231_v58 = vrot.slane %v230_v57, 4 }
 0x197   :  { %v232_v59 = vadd.f32 %v231_v58, %v230_v57 }
 0x199   :  { %v233_v60 = vrot.slane %v232_v59, 2 }
 0x19b   :  { %v234_v61 = vadd.f32 %v233_v60, %v232_v59 }
 0x19d   :  { %v235_v62 = vrot.slane %v234_v61, 1 }
 0x19f   :  { %v236_v63 = vadd.f32 %v235_v62, %v234_v61 }
 0x1a1   :  { %1158 = vmatmul.mubr.msk.f32.vlgmr.msra.gmra.mrb[0].mxu1 %vm223_vm5, %v236_v63  ;;  %v1417_v63 = vmov 27  }
 0x1a2   :  { %1320 = vset.pattern.permute.xlu1 %v1417_v63  ;;  %1321 = vset.pattern.permute.xlu0 %v1417_v63 }
 0x1a3   :  { %678 = vperm.xlu1 %1320, %v1492_v7   ;;  %682 = vperm.xlu0 %1321, %v1499_v8  }
 0x1a7   :  { %686 = vperm.xlu1 %1320, %v1506_v10  }
 0x1ab   :  { %690 = vperm.xlu1 %1320, %v1511_v11  }
 0x274   :  { %v306_v28 = vpop.f32.mrb[0].mxu1 }
 0x275   :  { %v313_v29 = vrot.slane %v306_v28, %v1610_v25  ;;  %v1159_v30 = vpop.f32.mrb[1].mxu1  ;;  %v470_v28 = vpop.permute.xlu0 %469 }
 0x277   :  { %v1614_v31 = vsub.f32 %v1563_v45, %v313_v29  ;;  %v1617_v32 = vsub.f32 %v1561_v41, %v313_v29  ;;  %v1620_v33 = vsub.f32 %v1571_v53, %v313_v29  ;;  %v1623_v34 = vsub.f32 %v1569_v52, %v313_v29  ;;  %v446_v52 = vpop.permute.xlu1 %445 }
 0x279   :  { %v318_v35 = vmul.f32 %v1614_v31, %v1614_v31  ;;  %v319_v36 = vmul.f32 %v1617_v32, %v1617_v32  ;;  %v320_v37 = vmul.f32 %v1620_v33, %v1620_v33  ;;  %v321_v38 = vmul.f32 %v1623_v34, %v1623_v34 }
 0x27b   :  { %v322_v39 = vsel %vm223_vm5, %v318_v35, 0.0  ;;  %v323_v40 = vsel %vm223_vm5, %v319_v36, 0.0  ;;  %v325_v42 = vsel %vm223_vm5, %v320_v37, 0.0  ;;  %v327_v44 = vsel %vm223_vm5, %v321_v38, 0.0  ;;  %v466_v53 = vpop.permute.xlu1 %465 }
 0x27c   :  { %v324_v41 = vadd.f32 %v323_v40, %v322_v39 }
 0x27e   :  { %v326_v43 = vadd.f32 %v325_v42, %v324_v41  ;;  %v474_v41 = vpop.permute.xlu0 %473 }
 0x27f   :  { %v1302_v54 = vpop.permute.xlu1 %1301 }
 0x280   :  { %v328_v45 = vadd.f32 %v327_v44, %v326_v43  ;;  %v1304_v55 = vunpack.i.h.bf16 %v1302_v54  ;;  %v1303_v56 = vunpack.i.l.bf16 %v1302_v54 }
 0x282   :  { %v329_v46 = vrot.slane %v328_v45, 4  ;;  %v1234_v57 = vpack.c.bf16 %v1304_v55, %v1303_v56 }
 0x283   :  { %v454_v58 = vpop.permute.xlu1 %453 }
 0x284   :  { %v330_v47 = vadd.f32 %v329_v46, %v328_v45  ;;  %1235 = vmatprep.subr.bf16.mxu1 %v1234_v57  ;;  %v478_v46 = vpop.permute.xlu0 %477 }
 0x285   :  { %1237 = vmatpush3.bf16.msra.mxu1 %v1234_v57 }
 0x286   :  { %v331_v48 = vrot.slane %v330_v47, 2 }
 0x287   :  { %v458_v59 = vpop.permute.xlu1 %457 }
 0x288   :  { %v332_v49 = vadd.f32 %v331_v48, %v330_v47  ;;  %v643_v48 = vpop.permute.xlu0 %642 }
 0x28a   :  { %v333_v50 = vrot.slane %v332_v49, 1 }
 0x28b   :  { %v1309_v60 = vpop.permute.xlu1 %1308 }
 0x28c   :  { %v334_v51 = vadd.f32 %v333_v50, %v332_v49  ;;  %v1311_v61 = vunpack.i.h.bf16 %v1309_v60  ;;  %v619_v50 = vpop.permute.xlu0 %618 }
 0x28e   :  { %1169 = vmatmul.mubr.msk.f32.vlgmr.msra.gmra.mrb[4].mxu0 %vm223_vm5, %v334_v51 }
 0x28f   :  { %1244 = vmatpush3.bf16.msra.mxu0 %v1538_v24  ;;  %1193 = vmatprep.mubr.msk.f32.mxu0 %vm1408_vm3, %v1409_v26  ;;  %v1310_v24 = vunpack.i.l.bf16 %v1309_v60 }
 0x290   :  { %1245 = vmatprep.subr.bf16.mxu0 %v1407_v23  ;;  %v595_v51 = vpop.permute.xlu0 %594 }
 0x291   :  { %v1238_v62 = vpack.c.bf16 %v1311_v61, %v1310_v24 }
 0x293   :  { %1247 = vmatpush3.bf16.msra.mxu0 %v1549_v27  ;;  %1239 = vmatprep.subr.bf16.mxu1 %v1238_v62 }
 0x294   :  { %1241 = vmatpush3.bf16.msra.mxu1 %v1238_v62 }
 0x295   :  { %1248 = vmatprep.subr.bf16.mxu1 %v1407_v23 }
 0x361   :  { %v420_v27 = vpop.f32.mrb[4].mxu0 }
 0x362   :  { %1330 = vrsqrt.f32 %v420_v27  ;;  %v1170_v0 = vpop.f32.mrb[5].mxu0  ;;  %vm426_vm9 = vcmp.eq.f32.partialorder %v420_v27, inf  ;;  %v429_v6 = vand.u32 2147483648, %v420_v27  ;;  %vm428_vm10 = vcmp.eq.f32.partialorder %v420_v27, 0.0 }
 0x36c   :  { %v1331_v1 = vpop.eup %1330 }
 0x36d   :  { %v425_v2 = vmul.f32 %v1331_v1, %v420_v27 }
 0x36f   :  { %v427_v9 = vsel %vm426_vm9, %v420_v27, %v425_v2 }
 0x370   :  { %v430_v14 = vsel %vm428_vm10, %v429_v6, %v427_v9 }
 0x371   :  { %v431_v16 = vadd.f32 1e-05, %v430_v14 }
 0x373   :  { %1332 = vrcp.f32 %v431_v16 }
 0x37d   :  { %v1333_v19 = vpop.eup %1332 }
 0x37e   :  { %v433_v20 = vmul.f32 %v1333_v19, %v431_v16 }
 0x380   :  { %v434_v21 = vsub.f32 2.0, %v433_v20 }
 0x382   :  { %v435_v22 = vmul.f32 %v1333_v19, %v434_v21 }
 0x384   :  { %v439_v29 = vrot.slane %v435_v22, %v1610_v25 }
 0x386   :  { %v440_v30 = vmul.f32 %v439_v29, %v1614_v31  ;;  %v442_v35 = vmul.f32 %v439_v29, %v1620_v33  ;;  %v441_v36 = vmul.f32 %v439_v29, %v1617_v32  ;;  %v443_v37 = vmul.f32 %v439_v29, %v1623_v34  ;;  %v639_v32 = vpop.permute.xlu1 %638 }
 0x387   :  { %v702_v29 = vstv %s1091_s12 }
 0x388   :  { %v460_v38 = vmul.f32 %v446_v52, %v440_v30  ;;  %v462_v39 = vmul.f32 %v454_v58, %v442_v35  ;;  %v461_v40 = vmul.f32 %v450_v17, %v441_v36  ;;  %v463_v44 = vmul.f32 %v458_v59, %v443_v37 }
 0x38a   :  { %v480_v42 = vadd.f32 %v466_v53, %v460_v38  ;;  %v481_v43 = vadd.f32 %v470_v28, %v461_v40  ;;  %v482_v45 = vadd.f32 %v474_v41, %v462_v39  ;;  %v483_v31 = vadd.f32 %v478_v46, %v463_v44  ;;  %v647_v33 = vpop.permute.xlu1 %646 }
 0x38c   :  { %1179 = vmatprep.mubr.msk.f32.mxu1 %vm223_vm5, %v480_v42  ;;  %v609_v57 = vmul.f32 %v595_v51, %v480_v42 }
 0x38d   :  { %1180 = vmatmul.mubr.msk.f32.vlgmr.msra.gmra.mrb[2].mxu1 %vm223_vm5, %v481_v43 }
 0x38e   :  { %1250 = vmatpush3.bf16.msra.mxu1 %v1578_v5  ;;  %1182 = vmatprep.mubr.msk.f32.mxu1 %vm223_vm5, %v482_v45  ;;  %v651_v34 = vpop.permute.xlu1 %650 }
 0x38f   :  { %1251 = vmatprep.subr.bf16.mxu1 %v1407_v23 }
 0x391   :  { %1183 = vmatmul.mubr.msk.f32.gmra.mrb[4].mxu1 %vm223_vm5, %v483_v31 }
 0x392   :  { %1253 = vmatpush3.bf16.msra.mxu1 %v1582_v15  ;;  %1204 = vmatprep.mubr.msk.f32.mxu1 %vm1408_vm3, %v1409_v26  ;;  %v599_v47 = vpop.permute.xlu1 %598  ;;  %v607_v15 = vpop.permute.xlu0 %606 }
 0x393   :  { %v610_v54 = vmul.f32 %v599_v47, %v481_v43  ;;  %v612_v62 = vmul.f32 %v607_v15, %v483_v31  ;;  %v1418_v15 = vmov 28  }
 0x394   :  { %1323 = vset.pattern.permute.xlu1 %v1418_v15  ;;  %1322 = vset.pattern.permute.xlu0 %v1418_v15 }
 0x396   :  { %v615_v49 = vpop.permute.xlu1 %614  ;;  %v683_v19 = vpop.permute.xlu0 %682 }
 0x39a   :  { %v603_v5 = vpop.permute.xlu1 %602 }
 0x39b   :  { %v611_v1 = vmul.f32 %v603_v5, %v482_v45 }
 0x39e   :  { %v623_v52 = vpop.permute.xlu1 %622 }
 0x3a2   :  { %v627_v26 = vpop.permute.xlu1 %626 }
 0x3a6   :  { %v679_v16 = vpop.permute.xlu1 %678 }
 0x3aa   :  { %v687_v17 = vpop.permute.xlu1 %686 }
 0x3ae   :  { %v691_v20 = vpop.permute.xlu1 %690 }
 0x460   :  { %v1181_v53 = vpop.f32.mrb[2].mxu1 }
 0x461   :  { %v630_v23 = vmul.f32 %v1181_v53, %v619_v50  ;;  %v654_v55 = vmul.f32 %v1181_v53, %v643_v48  ;;  %v574_v56 = vpop.f32.mrb[3].mxu1 }
 0x462   :  { %v629_v58 = vmul.f32 %v615_v49, %v574_v56  ;;  %v653_v59 = vmul.f32 %v639_v32, %v574_v56 }
 0x463   :  { %663 = vrot.lane.b32.xlu1 %v654_v55, %s1410_s2  ;;  %v634_v60 = vadd.f32 %v630_v23, %v610_v54 }
 0x464   :  { %661 = vrot.lane.b32.xlu0 %v653_v59, %s1410_s2  ;;  %v1184_v61 = vpop.f32.mrb[4].mxu1  ;;  %v633_v24 = vadd.f32 %v629_v58, %v609_v57  ;;  %v1419_v58 = vmov 29  }
 0x465   :  { %v632_v63 = vmul.f32 %v1184_v61, %v627_v26  ;;  %v656_v27 = vmul.f32 %v1184_v61, %v651_v34  ;;  %v584_v0 = vpop.f32.mrb[5].mxu1 }
 0x466   :  { %v631_v2 = vmul.f32 %v623_v52, %v584_v0  ;;  %v655_v6 = vmul.f32 %v647_v33, %v584_v0 }
 0x467   :  { %667 = vrot.lane.b32.xlu1 %v656_v27, %s1410_s2  ;;  %v636_v9 = vadd.f32 %v632_v63, %v612_v62 }
 0x468   :  { %665 = vrot.lane.b32.xlu0 %v655_v6, %s1410_s2  ;;  %v635_v14 = vadd.f32 %v631_v2, %v611_v1 }
 0x46b   :  { %920 = vperm.xlu1 %1323, %v1499_v8  }
 0x46c   :  { %916 = vperm.xlu0 %1322, %v1492_v7  }
 0x46f   :  { %1324 = vset.pattern.permute.xlu1 %v1419_v58 }
 0x470   :  { %1325 = vset.pattern.permute.xlu0 %v1419_v58  ;;  %936 = vperm.xlu1 %1324, %v1492_v7  }
 0x471   :  { %940 = vperm.xlu0 %1325, %v1499_v8  }
 0x474   :  { %1326 = vset.pattern.permute.xlu1 %v1418_v15 }
 0x475   :  { %944 = vperm.xlu0 %1325, %v1506_v10   ;;  %924 = vperm.xlu1 %1326, %v1506_v10  }
 0x479   :  { %1328 = vset.pattern.permute.xlu0 %v1414_v18  ;;  %928 = vperm.xlu1 %1326, %v1511_v11  }
 0x47d   :  { %1327 = vset.pattern.permute.xlu1 %v1419_v58 }
 0x47e   :  { %948 = vperm.xlu1 %1327, %v1511_v11  }
 0x482   :  { %1329 = vset.pattern.permute.xlu1 %v1414_v18 }
 0x4d5   :  { %v664_v21 = vpop.permute.xlu1 %663 }
 0x4d6   :  { %v674_v22 = vadd.f32 %v664_v21, %v634_v60  ;;  %v662_v28 = vpop.permute.xlu0 %661 }
 0x4d7   :  { %v673_v30 = vadd.f32 %v662_v28, %v633_v24  ;;  %v956_v28 = vld [vmem:[%s1723_s4 + $0x8] sm:$0xff] }
 0x4d8   :  { %v694_v35 = vadd.f32 %v683_v19, %v674_v22  ;;  %v955_v22 = vld [vmem:[%s1723_s4] sm:$0xff]  ;;  %964 = vperm.xlu1 %1329, %v956_v28   ;;  %s1420_s4 = smov 112  }
 0x4d9   :  { %v693_v36 = vadd.f32 %v679_v16, %v673_v30  ;;  %v668_v37 = vpop.permute.xlu1 %667  ;;  %959 = vperm.xlu0 %1328, %v955_v22  }
 0x4da   :  { %vm699_vm11 = vcmp.ge.f32.partialorder %v694_v35, 0.0  ;;  %v704_v38 = vmul.f32 %v702_v29, %v694_v35  ;;  %v676_v39 = vadd.f32 %v668_v37, %v636_v9  ;;  %v666_v40 = vpop.permute.xlu0 %665 }
 0x4db   :  { %vm698_vm12 = vcmp.ge.f32.partialorder %v693_v36, 0.0  ;;  %v703_v41 = vmul.f32 %v702_v29, %v693_v36  ;;  %v675_v42 = vadd.f32 %v666_v40, %v635_v14 }
 0x4dc   :  { %v708_v43 = vsel %vm699_vm11, %v694_v35, %v704_v38  ;;  %v696_v44 = vadd.f32 %v691_v20, %v676_v39 }
 0x4dd   :  { %v707_v45 = vsel %vm698_vm12, %v693_v36, %v703_v41  ;;  %v695_v46 = vadd.f32 %v687_v17, %v675_v42  ;;  %v712_v31 = vsel %vm223_vm5, %v708_v43, 0.0 }
 0x4de   :  { %v711_v32 = vsel %vm223_vm5, %v707_v45, 0.0  ;;  %vm701_vm13 = vcmp.ge.f32.partialorder %v696_v44, 0.0  ;;  %v706_v33 = vmul.f32 %v702_v29, %v696_v44 }
 0x4df   :  { %vm700_vm14 = vcmp.ge.f32.partialorder %v695_v46, 0.0  ;;  %v705_v34 = vmul.f32 %v702_v29, %v695_v46  ;;  %v713_v47 = vadd.f32 %v712_v31, %v711_v32 }
 0x4e0   :  { %v710_v48 = vsel %vm701_vm13, %v696_v44, %v706_v33 }
 0x4e1   :  { %v709_v49 = vsel %vm700_vm14, %v695_v46, %v705_v34  ;;  %v716_v51 = vsel %vm223_vm5, %v710_v48, 0.0 }
 0x4e2   :  { %v714_v50 = vsel %vm223_vm5, %v709_v49, 0.0 }
 0x4e3   :  { %v715_v5 = vadd.f32 %v714_v50, %v713_v47 }
 0x4e5   :  { %v717_v52 = vadd.f32 %v716_v51, %v715_v5 }
 0x4e7   :  { %v718_v53 = vrot.slane %v717_v52, 4 }
 0x4e9   :  { %v719_v54 = vadd.f32 %v718_v53, %v717_v52 }
 0x4ea   :  { %v921_v39 = vpop.permute.xlu1 %920 }
 0x4eb   :  { %v720_v23 = vrot.slane %v719_v54, 2  ;;  %v917_v44 = vpop.permute.xlu0 %916 }
 0x4ed   :  { %v721_v55 = vadd.f32 %v720_v23, %v719_v54 }
 0x4ef   :  { %v722_v56 = vrot.slane %v721_v55, 1  ;;  %v937_v42 = vpop.permute.xlu1 %936 }
 0x4f0   :  { %v941_v33 = vpop.permute.xlu0 %940 }
 0x4f1   :  { %v723_v57 = vadd.f32 %v722_v56, %v721_v55 }
 0x4f3   :  { %1194 = vmatmul.mubr.msk.f32.vlgmr.msra.gmra.mrb[6].mxu0 %vm223_vm5, %v723_v57 }
 0x4f4   :  { %1215 = vmatprep.mubr.msk.f32.mxu0 %vm223_vm5, %v955_v22  ;;  %v945_v52 = vpop.permute.xlu0 %944 }
 0x5c6   :  { %v793_v59 = vpop.f32.mrb[6].mxu0 }
 0x5c7   :  { %v800_v26 = vrot.slane %v793_v59, %v1610_v25  ;;  %v1195_v7 = vpop.f32.mrb[7].mxu0 }
 0x5c8   :  { %v960_v7 = vpop.permute.xlu0 %959 }
 0x5c9   :  { %v801_v60 = vsub.f32 %v707_v45, %v800_v26  ;;  %v802_v8 = vsub.f32 %v708_v43, %v800_v26  ;;  %v803_v61 = vsub.f32 %v709_v49, %v800_v26  ;;  %v804_v24 = vsub.f32 %v710_v48, %v800_v26  ;;  %v925_v43 = vpop.permute.xlu1 %924 }
 0x5cb   :  { %v805_v62 = vmul.f32 %v801_v60, %v801_v60  ;;  %v806_v63 = vmul.f32 %v802_v8, %v802_v8  ;;  %v807_v10 = vmul.f32 %v803_v61, %v803_v61  ;;  %v808_v27 = vmul.f32 %v804_v24, %v804_v24 }
 0x5cd   :  { %v809_v0 = vsel %vm223_vm5, %v805_v62, 0.0  ;;  %v810_v1 = vsel %vm223_vm5, %v806_v63, 0.0  ;;  %v812_v11 = vsel %vm223_vm5, %v807_v10, 0.0  ;;  %v814_v6 = vsel %vm223_vm5, %v808_v27, 0.0  ;;  %v929_v32 = vpop.permute.xlu1 %928 }
 0x5ce   :  { %v811_v2 = vadd.f32 %v810_v1, %v809_v0 }
 0x5d0   :  { %v813_v18 = vadd.f32 %v812_v11, %v811_v2 }
 0x5d1   :  { %v949_v51 = vpop.permute.xlu1 %948 }
 0x5d2   :  { %v815_v9 = vadd.f32 %v814_v6, %v813_v18 }
 0x5d4   :  { %v816_v14 = vrot.slane %v815_v9, 4 }
 0x5d6   :  { %v817_v16 = vadd.f32 %v816_v14, %v815_v9 }
 0x5d8   :  { %v818_v17 = vrot.slane %v817_v16, 2 }
 0x5da   :  { %v819_v19 = vadd.f32 %v818_v17, %v817_v16 }
 0x5dc   :  { %v820_v20 = vrot.slane %v819_v19, 1 }
 0x5de   :  { %v821_v21 = vadd.f32 %v820_v20, %v819_v19 }
 0x5e0   :  { %1205 = vmatmul.mubr.msk.f32.vlgmr.msra.gmra.mrb[6].mxu1 %vm223_vm5, %v821_v21 }
 0x6b3   :  { %v891_v29 = vpop.f32.mrb[6].mxu1 }
 0x6b4   :  { %1334 = vrsqrt.f32 %v891_v29  ;;  %v1206_v30 = vpop.f32.mrb[7].mxu1  ;;  %vm897_vm15 = vcmp.eq.f32.partialorder %v891_v29, inf  ;;  %v900_v37 = vand.u32 2147483648, %v891_v29  ;;  %vm899_vm1 = vcmp.eq.f32.partialorder %v891_v29, 0.0 }
 0x6be   :  { %v1335_v35 = vpop.eup %1334 }
 0x6bf   :  { %v896_v36 = vmul.f32 %v1335_v35, %v891_v29 }
 0x6c1   :  { %v898_v38 = vsel %vm897_vm15, %v891_v29, %v896_v36 }
 0x6c2   :  { %v901_v40 = vsel %vm899_vm1, %v900_v37, %v898_v38 }
 0x6c3   :  { %v902_v41 = vadd.f32 1e-05, %v901_v40 }
 0x6c5   :  { %1336 = vrcp.f32 %v902_v41 }
 0x6cf   :  { %v1337_v45 = vpop.eup %1336 }
 0x6d0   :  { %v904_v46 = vmul.f32 %v1337_v45, %v902_v41 }
 0x6d2   :  { %v905_v31 = vsub.f32 2.0, %v904_v46 }
 0x6d4   :  { %v906_v34 = vmul.f32 %v1337_v45, %v905_v31 }
 0x6d6   :  { %v910_v47 = vrot.slane %v906_v34, %v1610_v25  ;;  %v965_v25 = vpop.permute.xlu1 %964 }
 0x6d8   :  { %v912_v48 = vmul.f32 %v910_v47, %v802_v8  ;;  %v913_v49 = vmul.f32 %v910_v47, %v803_v61  ;;  %v911_v50 = vmul.f32 %v910_v47, %v801_v60  ;;  %v914_v5 = vmul.f32 %v910_v47, %v804_v24 }
 0x6da   :  { %v932_v53 = vmul.f32 %v921_v39, %v912_v48  ;;  %v933_v54 = vmul.f32 %v925_v43, %v913_v49  ;;  %v931_v23 = vmul.f32 %v917_v44, %v911_v50  ;;  %v934_v55 = vmul.f32 %v929_v32, %v914_v5 }
 0x6dc   :  { %v951_v56 = vadd.f32 %v937_v42, %v931_v23  ;;  %v952_v57 = vadd.f32 %v941_v33, %v932_v53  ;;  %v954_v15 = vadd.f32 %v949_v51, %v934_v55  ;;  %v953_v58 = vadd.f32 %v945_v52, %v933_v54 }
 0x6de   :  { %v1254_v59 = vpack.c.bf16 %v952_v57, %v951_v56  ;;  %v1258_v26 = vpack.c.bf16 %v954_v15, %v953_v58 }
 0x6e0   :  { %1255 = vmatprep.subr.bf16.mxu0 %v1254_v59 }
 0x6e1   :  { %1257 = vmatpush3.bf16.msra.mxu0 %v1254_v59 }
 0x6e2   :  { %1259 = vmatprep.subr.bf16.mxu0 %v1258_v26 }
 0x6e5   :  { %1261 = vmatpush3.bf16.msra.mxu0 %v1258_v26 }
 0x6e8   :  { %1216 = vmatmul.mubr.msk.f32.vlgmr.msra.gmra.mrb[8].mxu0 %vm223_vm5, %v956_v28 }
 0x7bb   :  { %v1217_v60 = vpop.f32.mrb[8].mxu0 }
 0x7bc   :  { %v1043_v8 = vadd.f32 %v1217_v60, %v965_v25  ;;  %v1037_v61 = vpop.f32.mrb[9].mxu0 }
 0x7bd   :  { %v1038_v24 = vadd.f32 %v1037_v61, %v960_v7 }
 0x7be   :  { %v1047_v62 = vadd.f32 %v1043_v8, %v1480_v4  ;;  %v1051_v63 = vadd.f32 %v1043_v8, %v1518_v13 }
 0x7bf   :  { %v1046_v10 = vadd.f32 %v1038_v24, %v1478_v3  ;;  %v1050_v27 = vadd.f32 %v1038_v24, %v1515_v12 }
 0x7c0   :  { %1049 = vst.msk [vmem:[#allocation8 + $0x8] sm:$0xff] %vm53_vm0, %v1047_v62  ;;  %1056 = vrot.lane.b32.xlu0 %v1051_v63, %s1420_s4 }
 0x7c1   :  { %1048 = vst.msk [vmem:[#allocation8] sm:$0xff] %vm53_vm0, %v1046_v10  ;;  %1054 = vrot.lane.b32.xlu1 %v1050_v27, %s1420_s4 }
 0x832   :  { %v1057_v0 = vpop.permute.xlu0 %1056 }
 0x833   :  { %1062 = vst.msk [vmem:[#allocation8 + $0x18] sm:$0xff] %vm53_vm0, %v1057_v0  ;;  %v1055_v4 = vpop.permute.xlu1 %1054 }
 0x834   :  { %1061 = vst.msk [vmem:[#allocation8 + $0x10] sm:$0xff] %vm53_vm0, %v1055_v4 }
 0x835   :  { %1383 = shalt.err (!%p1380_p3)
}
 0x836   :  { %s1384_s21 = scalar_lea.hbm %s1725_s6, 512 }
 0x837   :  { %p1385_p4 = scmp.ne.s32.totalorder %s1725_s6, %s1384_s21  ;;  %p1388_p5 = scmp.lt.u32.totalorder %s1384_s21, %s1725_s6 }
 0x839   :  { %p1390_p6 = pnand %p1388_p5, %p1385_p4 }
 0x83b   :  { %1393 = shalt.err (!%p1390_p6)
}
 0x83c   :  { %1074 = dma.vmem_to_hbm [thread:$0]  %s1069_s17, 512, %s1725_s6, [#allocation5], %s1401_s5, %s1401_s5, %s1402_s10  }
 0x83d   :  { %1398 = dma.done.wait [#allocation5], 512  }
 0x83e   :  { %1399 = vsyncadd [#allocation5], 4294966784 }
 0x83f   :  { %1078 = vsyncpa [#allocation4], 1 }
 0x840   :  { %1079 = vsyncpa [#allocation5], 1 }
 0x841   :  { %1080 = vsyncpa [#allocation6], 1 }

</bundles_post_ra>
